<compile_context>
chip_gen: v7x
topology: tpu7x:2x2x1
jax: 0.10.0
libtpu: 0.0.40
codegen_flags: <defaults>
</compile_context>

<pallas_src>
import functools
import math

import jax
import jax.numpy as jnp
from jax.experimental import pallas as pl
from jax.experimental.pallas import tpu as pltpu


def _layer_norm(x, eps=1e-5):
    # PyTorch LayerNorm semantics: biased variance over last dim, gamma=1, beta=0.
    mu = jnp.mean(x, axis=-1, keepdims=True)
    var = jnp.mean((x - mu) ** 2, axis=-1, keepdims=True)
    return (x - mu) * jax.lax.rsqrt(var + eps)


def encoder_kernel(x_ref, wqkv_ref, wfc_ref, w1_ref, w2_ref,
                   out_ref, attn_ref, *, n_heads, d_k, d_v, compute_dtype):
    """One (batch-block, layer) grid step of the fused Encoder.

    x_ref    : [Bb, S, D]        input block (only consumed at layer 0)
    wqkv_ref : [1, D, H*(2dk+dv)] fused Q|K|V projection for this layer (compute dtype)
    wfc_ref  : [1, H*dv, D]       output projection for this layer
    w1_ref   : [1, D, d_ff]       FFN first linear
    w2_ref   : [1, d_ff, D]       FFN second linear
    out_ref  : [Bb, S, D]         activation carry across the layer axis + final output
    attn_ref : [1, Bb, S, H*S]    lane-dense attention slab for this layer
    """
    layer = pl.program_id(1)
    Bb, S, D = x_ref.shape
    H = n_heads
    cdt = compute_dtype
    scale = 1.0 / math.sqrt(d_k)

    # Layer 0: seed the activation carry (out block is resident across the layer axis).
    @pl.when(layer == 0)
    def _():
        out_ref[...] = x_ref[...]

    # Activation rows flattened to [R, D] (R = Bb*S) via tile-aligned sublane concat
    # (no in-kernel reshape/transpose needed).
    x = jnp.concatenate([out_ref[b] for b in range(Bb)], axis=0).astype(jnp.float32)

    # ---- fused QKV projection: ONE [R, D] @ [D, H*(2*dk+dv)] MXU matmul ----
    qkv = jnp.dot(x.astype(cdt), wqkv_ref[0],
                  preferred_element_type=jnp.float32)            # [R, H*(2dk+dv)]

    def split_heads(col0, dh):
        # columns [col0, col0 + H*dh) of qkv -> [Bb*H, S, dh] (static slices only)
        return jnp.stack(
            [qkv[b * S:(b + 1) * S, col0 + h * dh: col0 + (h + 1) * dh]
             for b in range(Bb) for h in range(H)], axis=0)

    q = split_heads(0, d_k)                                      # [G, S, dk]
    k = split_heads(H * d_k, d_k)                                # [G, S, dk]
    v = split_heads(2 * H * d_k, d_v)                            # [G, S, dv]

    # ---- scaled dot-product attention; all (batch, head) pairs batched on axis 0 ----
    s = jnp.einsum('gqd,gkd->gqk', q.astype(cdt), k.astype(cdt),
                   preferred_element_type=jnp.float32) * scale   # [G, S, S]
    s = s - jnp.max(s, axis=-1, keepdims=True)
    e = jnp.exp(s)
    # EUP approx reciprocal: rows of the returned attention sum to 1 only to ~1e-4.
    probs = e * pl.reciprocal(jnp.sum(e, axis=-1, keepdims=True), approx=True)

    ctx = jnp.einsum('gqk,gkv->gqv', probs.astype(cdt), v.astype(cdt),
                     preferred_element_type=jnp.float32)         # [G, S, dv]

    # ---- single lane-dense attention store per (layer, block) step: [Bb, S, H*S] ----
    attn_ref[0] = jnp.stack(
        [jnp.concatenate([probs[b * H + h] for h in range(H)], axis=-1)
         for b in range(Bb)], axis=0).astype(attn_ref.dtype)

    # ---- output projection with the head reduction folded into ONE matmul ----
    ctx_flat = jnp.concatenate(
        [jnp.concatenate([ctx[b * H + h] for h in range(H)], axis=-1)   # [S, H*dv]
         for b in range(Bb)], axis=0)                            # [R, H*dv]
    attn_out = jnp.dot(ctx_flat.astype(cdt), wfc_ref[0],
                       preferred_element_type=jnp.float32)       # [R, D]
    y = _layer_norm(attn_out + x)                                # residual + LN (f32)

    # ---- position-wise FFN ----
    h1 = jnp.maximum(jnp.dot(y.astype(cdt), w1_ref[0],
                             preferred_element_type=jnp.float32), 0.0)
    h2 = jnp.dot(h1.astype(cdt), w2_ref[0],
                 preferred_element_type=jnp.float32)
    new_x = _layer_norm(h2 + y)                                  # residual + LN (f32)

    # Write the carry back (picked up by the next layer step / final HBM writeback).
    for b in range(Bb):
        out_ref[b] = new_x[b * S:(b + 1) * S, :].astype(out_ref.dtype)


def _pack_weights(layer_params, compute_dtype):
    """Stack per-layer weights along a leading [L, ...] axis.

    Each Linear weight is stored [in_features, out_features] (y = x @ W). The Q|K|V
    projections are concatenated into one [D, H*(2*dk+dv)] matrix per layer so the
    kernel does a single fused projection matmul."""
    wqkv, wfc, w1, w2 = [], [], [], []
    for (wq, wk, wv, fc, w1_, w2_) in layer_params:
        wqkv.append(jnp.concatenate([wq, wk, wv], axis=1))       # [D, H*(2dk+dv)]
        wfc.append(fc)                                           # [H*dv, D]
        w1.append(w1_)                                           # [D, d_ff]
        w2.append(w2_)                                           # [d_ff, D]
    cast = lambda xs: jnp.stack(xs).astype(compute_dtype)
    return cast(wqkv), cast(wfc), cast(w1), cast(w2)


def encoder_forward(x, layer_params, *, n_heads, d_k, d_v,
                    batch_block=1, compute_dtype=jnp.bfloat16):
    """Encoder.forward: all layers fused into one pallas_call.

    x: [B, S, D].  layer_params: list of (wq, wk, wv, wfc, w1, w2), each
    [in_features, out_features].  Returns (out [B,S,D], [attn [B,H,S,S] per layer]).

    batch_block: batch elements per grid step (use B on single-TC v5e/v6e; keep
    B // batch_block >= 2 on v7x so both TensorCores stay busy).
    """
    B, S, D = x.shape
    L = len(layer_params)
    H = n_heads
    d_ff = layer_params[0][4].shape[1]
    Bb = batch_block
    assert B % Bb == 0, "batch must be divisible by batch_block"

    wqkv_s, wfc_s, w1_s, w2_s = _pack_weights(layer_params, compute_dtype)
    C = wqkv_s.shape[-1]                                         # H*(2*dk+dv)

    # Advisory cost estimate (FLOPs ~ 2*MACs).
    flops = int(2 * B * L * S * (D * C + H * S * d_k + H * S * d_v
                                 + H * d_v * D + 2 * D * d_ff))
    transcendentals = int(B * L * S * (H * S + H + 2))           # exp + recip + rsqrt
    wbytes = jnp.dtype(compute_dtype).itemsize
    bytes_accessed = int(x.dtype.itemsize * 2 * B * S * D
                         + 4 * L * B * S * H * S
                         + wbytes * (wqkv_s.size + wfc_s.size + w1_s.size + w2_s.size)
                           * (B // Bb))

    kernel = functools.partial(encoder_kernel, n_heads=H, d_k=d_k, d_v=d_v,
                               compute_dtype=compute_dtype)

    out, attn_slab = pl.pallas_call(
        kernel,
        out_shape=(
            jax.ShapeDtypeStruct((B, S, D), x.dtype),
            jax.ShapeDtypeStruct((L, B, S, H * S), jnp.float32),
        ),
        grid_spec=pltpu.PrefetchScalarGridSpec(
            num_scalar_prefetch=0,
            grid=(B // Bb, L),                      # (batch blocks, layers)
            in_specs=[
                pl.BlockSpec((Bb, S, D), lambda b, l: (b, 0, 0)),
                pl.BlockSpec((1, D, C), lambda b, l: (l, 0, 0)),
                pl.BlockSpec((1, H * d_v, D), lambda b, l: (l, 0, 0)),
                pl.BlockSpec((1, D, d_ff), lambda b, l: (l, 0, 0)),
                pl.BlockSpec((1, d_ff, D), lambda b, l: (l, 0, 0)),
            ],
            out_specs=[
                # same block across the layer axis -> VMEM-resident activation carry
                pl.BlockSpec((Bb, S, D), lambda b, l: (b, 0, 0)),
                pl.BlockSpec((1, Bb, S, H * S), lambda b, l: (l, b, 0, 0)),
            ],
        ),
        compiler_params=pltpu.CompilerParams(
            dimension_semantics=("parallel", "arbitrary")),
        cost_estimate=pl.CostEstimate(flops=flops,
                                      transcendentals=transcendentals,
                                      bytes_accessed=bytes_accessed),
    )(x, wqkv_s, wfc_s, w1_s, w2_s)

    # [L, B, S, H*S] -> per-layer [B, H, S, S]   (layout plumbing outside the kernel)
    attn = attn_slab.reshape(L, B, S, H, S).transpose(0, 1, 3, 2, 4)
    return out, [attn[i] for i in range(L)]


# ---------------- pure-JAX reference (same math) for verification ----------------
def _ref_layer(x, params, n_heads, d_k, d_v, cdt):
    wq, wk, wv, wfc, w1, w2 = params
    B, S, D = x.shape

    def proj(a, w):   # matmul with operands cast to cdt, f32 accumulation
        return jnp.einsum('bsd,df->bsf', a.astype(cdt), w.astype(cdt),
                          preferred_element_type=jnp.float32)

    q = proj(x, wq).reshape(B, S, n_heads, d_k).transpose(0, 2, 1, 3)
    k = proj(x, wk).reshape(B, S, n_heads, d_k).transpose(0, 2, 1, 3)
    v = proj(x, wv).reshape(B, S, n_heads, d_v).transpose(0, 2, 1, 3)
    scores = jnp.einsum('bhqd,bhkd->bhqk', q.astype(cdt), k.astype(cdt),
                        preferred_element_type=jnp.float32) / math.sqrt(d_k)
    attn = jax.nn.softmax(scores, axis=-1)
    ctx = jnp.einsum('bhqk,bhkd->bhqd', attn.astype(cdt), v.astype(cdt),
                     preferred_element_type=jnp.float32)
    ctx = ctx.transpose(0, 2, 1, 3).reshape(B, S, n_heads * d_v)
    y = _layer_norm(proj(ctx, wfc) + x)
    h = jnp.maximum(proj(y, w1), 0.0)
    out = _layer_norm(proj(h, w2) + y)
    return out, attn


def _ref_encoder(x, layer_params, n_heads, d_k, d_v, cdt=jnp.float32):
    attns = []
    out = x
    for p in layer_params:
        out, a = _ref_layer(out, p, n_heads, d_k, d_v, cdt)
        attns.append(a)
    return out, attns


if __name__ == "__main__":
    # Small config consistent with the module's constructor.
    batch, seq = 2, 8                 # len_q = len_k = seq
    d_model, d_ff = 32, 64
    d_k = d_v = 8
    n_heads = 4
    n_layers = 2

    key = jax.random.PRNGKey(0)
    key, xk = jax.random.split(key)
    x = jax.random.normal(xk, (batch, seq, d_model), dtype=jnp.float32)

    def init_linear(k, fan_in, fan_out):
        return (jax.random.normal(k, (fan_in, fan_out), dtype=jnp.float32)
                / jnp.sqrt(jnp.float32(fan_in)))

    layer_params = []
    for _ in range(n_layers):
        key, k1, k2, k3, k4, k5, k6 = jax.random.split(key, 7)
        layer_params.append((
            init_linear(k1, d_model, d_k * n_heads),      # W_Q  [D, H*dk]
            init_linear(k2, d_model, d_k * n_heads),      # W_K  [D, H*dk]
            init_linear(k3, d_model, d_v * n_heads),      # W_V  [D, H*dv]
            init_linear(k4, n_heads * d_v, d_model),      # fc   [H*dv, D]
            init_linear(k5, d_model, d_ff),               # FFN 1
            init_linear(k6, d_ff, d_model),               # FFN 2
        ))

    # References: exact f32 module semantics, and one with bf16-cast matmul operands
    # (matches the kernel's compute dtype so the tight tolerance is meaningful).
    ref_out_f32, ref_attn_f32 = _ref_encoder(x, layer_params, n_heads, d_k, d_v,
                                             jnp.float32)
    ref_out_bf16, ref_attn_bf16 = _ref_encoder(x, layer_params, n_heads, d_k, d_v,
                                               jnp.bfloat16)

    def check(out, attns, ref_out, ref_attns, tol):
        assert out.shape == (batch, seq, d_model)
        assert all(a.shape == (batch, n_heads, seq, seq) for a in attns)
        assert jnp.allclose(out, ref_out, atol=tol, rtol=tol), \
            float(jnp.max(jnp.abs(out - ref_out)))
        for a, ra in zip(attns, ref_attns):
            assert jnp.allclose(a, ra, atol=tol, rtol=tol), \
                float(jnp.max(jnp.abs(a - ra)))

    # Config 1: one batch element per grid step (grid=(2, L)) -> both v7x TCs busy.
    out1, attns1 = encoder_forward(x, layer_params, n_heads=n_heads, d_k=d_k, d_v=d_v,
                                   batch_block=1, compute_dtype=jnp.bfloat16)
    out1 = jax.block_until_ready(out1)
    attns1 = [jax.block_until_ready(a) for a in attns1]
    check(out1, attns1, ref_out_bf16, ref_attn_bf16, 2e-2)   # vs matched-precision ref
    check(out1, attns1, ref_out_f32, ref_attn_f32, 6e-2)     # vs exact f32 module math

    # Config 2: whole batch per grid step (grid=(1, L)) -> single-TC v5e/v6e layout.
    out2, attns2 = encoder_forward(x, layer_params, n_heads=n_heads, d_k=d_k, d_v=d_v,
                                   batch_block=batch, compute_dtype=jnp.bfloat16)
    out2 = jax.block_until_ready(out2)
    attns2 = [jax.block_until_ready(a) for a in attns2]
    check(out2, attns2, ref_out_bf16, ref_attn_bf16, 2e-2)

    print("KERNEL_OK")
</pallas_src>

<mosaic_0001>
module attributes {stable_mosaic.version = 11 : i64} {
  func.func @encoder_kernel(%arg0: i32, %arg1: i32, %arg2: memref<1x8x32xf32, #tpu.memory_space<vmem>>, %arg3: memref<1x32x96xbf16, #tpu.memory_space<vmem>>, %arg4: memref<1x32x32xbf16, #tpu.memory_space<vmem>>, %arg5: memref<1x32x64xbf16, #tpu.memory_space<vmem>>, %arg6: memref<1x64x32xbf16, #tpu.memory_space<vmem>>, %arg7: memref<1x8x32xf32, #tpu.memory_space<vmem>>, %arg8: memref<1x1x8x32xf32, #tpu.memory_space<vmem>>) attributes {dimension_semantics = [#tpu.dimension_semantics<parallel>, #tpu.dimension_semantics<arbitrary>], iteration_bounds = array<i64: 2, 2>, scalar_prefetch = 0 : i64, scratch_operands = 0 : i64, tpu.core_type = #tpu.core_type<tc>, window_params = [{transform_indices = @transform_0, window_bounds = array<i64: 1, 8, 32>}, {transform_indices = @transform_1, window_bounds = array<i64: 1, 32, 96>}, {transform_indices = @transform_2, window_bounds = array<i64: 1, 32, 32>}, {transform_indices = @transform_3, window_bounds = array<i64: 1, 32, 64>}, {transform_indices = @transform_4, window_bounds = array<i64: 1, 64, 32>}, {transform_indices = @transform_5, window_bounds = array<i64: 1, 8, 32>}, {transform_indices = @transform_6, window_bounds = array<i64: 1, 1, 8, 32>}]} {
    %c0_i32 = arith.constant 0 : i32
    %0 = arith.cmpi eq, %arg1, %c0_i32 : i32
    %1 = arith.extui %0 : i1 to i32
    %c0_i32_0 = arith.constant 0 : i32
    %2 = arith.cmpi ne, %1, %c0_i32_0 : i32
    scf.if %2 {
      %c0_41 = arith.constant 0 : index
      %c0_42 = arith.constant 0 : index
      %c0_43 = arith.constant 0 : index
      %131 = vector.load %arg2[%c0_41, %c0_42, %c0_43] : memref<1x8x32xf32, #tpu.memory_space<vmem>>, vector<1x8x32xf32>
      %c0_44 = arith.constant 0 : index
      %c0_45 = arith.constant 0 : index
      %c0_46 = arith.constant 0 : index
      %132 = vector.load %arg7[%c0_44, %c0_45, %c0_46] : memref<1x8x32xf32, #tpu.memory_space<vmem>>, vector<1x8x32xf32>
      tpu.vector_store %arg7[%c0_44, %c0_45, %c0_46], %131 {strides = array<i32>} : memref<1x8x32xf32, #tpu.memory_space<vmem>>, vector<1x8x32xf32>,
    } else {
    }
    %c0 = arith.constant 0 : index
    %c0_1 = arith.constant 0 : index
    %c0_2 = arith.constant 0 : index
    %3 = vector.load %arg7[%c0, %c0_1, %c0_2] : memref<1x8x32xf32, #tpu.memory_space<vmem>>, vector<1x8x32xf32>
    %4 = vector.shape_cast %3 : vector<1x8x32xf32> to vector<8x32xf32>
    %5 = arith.truncf %4 : vector<8x32xf32> to vector<8x32xbf16>
    %c0_3 = arith.constant 0 : index
    %c0_4 = arith.constant 0 : index
    %c0_5 = arith.constant 0 : index
    %6 = vector.load %arg3[%c0_3, %c0_4, %c0_5] : memref<1x32x96xbf16, #tpu.memory_space<vmem>>, vector<1x32x96xbf16>
    %7 = vector.shape_cast %6 : vector<1x32x96xbf16> to vector<32x96xbf16>
    %cst = arith.constant dense<0.000000e+00> : vector<8x96xf32>
    %8 = tpu.matmul %5, %7, %cst {dimension_numbers = #tpu.dot_dimension_numbers<[1], [0], [0], [1], [0, 0, 1, 1], [], []>} : vector<8x32xbf16>, vector<32x96xbf16>, vector<8x96xf32> -> vector<8x96xf32>
    %9 = vector.extract_strided_slice %8 {offsets = [0, 0], sizes = [8, 8], strides = [1, 1]} : vector<8x96xf32> to vector<8x8xf32>
    %10 = vector.extract_strided_slice %8 {offsets = [0, 8], sizes = [8, 8], strides = [1, 1]} : vector<8x96xf32> to vector<8x8xf32>
    %11 = vector.extract_strided_slice %8 {offsets = [0, 16], sizes = [8, 8], strides = [1, 1]} : vector<8x96xf32> to vector<8x8xf32>
    %12 = vector.extract_strided_slice %8 {offsets = [0, 24], sizes = [8, 8], strides = [1, 1]} : vector<8x96xf32> to vector<8x8xf32>
    %13 = vector.shape_cast %9 : vector<8x8xf32> to vector<1x8x8xf32>
    %14 = vector.shape_cast %10 : vector<8x8xf32> to vector<1x8x8xf32>
    %15 = vector.shape_cast %11 : vector<8x8xf32> to vector<1x8x8xf32>
    %16 = vector.shape_cast %12 : vector<8x8xf32> to vector<1x8x8xf32>
    %17 = tpu.concatenate %13, %14, %15, %16 in 0 : vector<1x8x8xf32>, vector<1x8x8xf32>, vector<1x8x8xf32>, vector<1x8x8xf32> -> vector<4x8x8xf32>
    %18 = vector.extract_strided_slice %8 {offsets = [0, 32], sizes = [8, 8], strides = [1, 1]} : vector<8x96xf32> to vector<8x8xf32>
    %19 = vector.extract_strided_slice %8 {offsets = [0, 40], sizes = [8, 8], strides = [1, 1]} : vector<8x96xf32> to vector<8x8xf32>
    %20 = vector.extract_strided_slice %8 {offsets = [0, 48], sizes = [8, 8], strides = [1, 1]} : vector<8x96xf32> to vector<8x8xf32>
    %21 = vector.extract_strided_slice %8 {offsets = [0, 56], sizes = [8, 8], strides = [1, 1]} : vector<8x96xf32> to vector<8x8xf32>
    %22 = vector.shape_cast %18 : vector<8x8xf32> to vector<1x8x8xf32>
    %23 = vector.shape_cast %19 : vector<8x8xf32> to vector<1x8x8xf32>
    %24 = vector.shape_cast %20 : vector<8x8xf32> to vector<1x8x8xf32>
    %25 = vector.shape_cast %21 : vector<8x8xf32> to vector<1x8x8xf32>
    %26 = tpu.concatenate %22, %23, %24, %25 in 0 : vector<1x8x8xf32>, vector<1x8x8xf32>, vector<1x8x8xf32>, vector<1x8x8xf32> -> vector<4x8x8xf32>
    %27 = vector.extract_strided_slice %8 {offsets = [0, 64], sizes = [8, 8], strides = [1, 1]} : vector<8x96xf32> to vector<8x8xf32>
    %28 = vector.extract_strided_slice %8 {offsets = [0, 72], sizes = [8, 8], strides = [1, 1]} : vector<8x96xf32> to vector<8x8xf32>
    %29 = vector.extract_strided_slice %8 {offsets = [0, 80], sizes = [8, 8], strides = [1, 1]} : vector<8x96xf32> to vector<8x8xf32>
    %30 = vector.extract_strided_slice %8 {offsets = [0, 88], sizes = [8, 8], strides = [1, 1]} : vector<8x96xf32> to vector<8x8xf32>
    %31 = vector.shape_cast %27 : vector<8x8xf32> to vector<1x8x8xf32>
    %32 = vector.shape_cast %28 : vector<8x8xf32> to vector<1x8x8xf32>
    %33 = vector.shape_cast %29 : vector<8x8xf32> to vector<1x8x8xf32>
    %34 = vector.shape_cast %30 : vector<8x8xf32> to vector<1x8x8xf32>
    %35 = tpu.concatenate %31, %32, %33, %34 in 0 : vector<1x8x8xf32>, vector<1x8x8xf32>, vector<1x8x8xf32>, vector<1x8x8xf32> -> vector<4x8x8xf32>
    %36 = arith.truncf %17 : vector<4x8x8xf32> to vector<4x8x8xbf16>
    %37 = arith.truncf %26 : vector<4x8x8xf32> to vector<4x8x8xbf16>
    "tpu.trace_start"() <{level = 10 : i32, message = "gqd,gkd->gqk"}> : () -> ()
    %cst_6 = arith.constant dense<0.000000e+00> : vector<4x8x8xf32>
    %38 = tpu.matmul %36, %37, %cst_6 {dimension_numbers = #tpu.dot_dimension_numbers<[2], [2], [1], [1], [0, 0, 0, 1, 1, 1], [0], [0]>} : vector<4x8x8xbf16>, vector<4x8x8xbf16>, vector<4x8x8xf32> -> vector<4x8x8xf32>
    "tpu.trace_stop"() : () -> ()
    %cst_7 = arith.constant 0.353553385 : f32
    %39 = vector.broadcast %cst_7 : f32 to vector<4x8x8xf32>
    %40 = arith.mulf %38, %39 : vector<4x8x8xf32>
    %cst_8 = arith.constant dense<0xFF800000> : vector<4x8xf32>
    %41 = vector.multi_reduction <maximumf>, %40, %cst_8 [2] : vector<4x8x8xf32> to vector<4x8xf32>
    %42 = vector.shape_cast %41 : vector<4x8xf32> to vector<4x8x1xf32>
    %43 = vector.broadcast %42 : vector<4x8x1xf32> to vector<4x8x8xf32>
    %44 = arith.subf %40, %43 : vector<4x8x8xf32>
    %45 = math.exp %44 : vector<4x8x8xf32>
    %cst_9 = arith.constant dense<0.000000e+00> : vector<4x8xf32>
    %46 = vector.multi_reduction <add>, %45, %cst_9 [2] : vector<4x8x8xf32> to vector<4x8xf32>
    %47 = vector.shape_cast %46 : vector<4x8xf32> to vector<4x8x1xf32>
    %48 = tpu.reciprocal %47 {approx = true} : vector<4x8x1xf32> -> vector<4x8x1xf32>
    %49 = vector.broadcast %48 : vector<4x8x1xf32> to vector<4x8x8xf32>
    %50 = arith.mulf %45, %49 : vector<4x8x8xf32>
    %51 = arith.truncf %50 : vector<4x8x8xf32> to vector<4x8x8xbf16>
    %52 = arith.truncf %35 : vector<4x8x8xf32> to vector<4x8x8xbf16>
    "tpu.trace_start"() <{level = 10 : i32, message = "gqk,gkv->gqv"}> : () -> ()
    %cst_10 = arith.constant dense<0.000000e+00> : vector<4x8x8xf32>
    %53 = tpu.matmul %51, %52, %cst_10 {dimension_numbers = #tpu.dot_dimension_numbers<[2], [1], [1], [2], [0, 0, 0, 1, 1, 2], [0], [0]>} : vector<4x8x8xbf16>, vector<4x8x8xbf16>, vector<4x8x8xf32> -> vector<4x8x8xf32>
    "tpu.trace_stop"() : () -> ()
    %54 = vector.extract_strided_slice %50 {offsets = [0, 0, 0], sizes = [1, 8, 8], strides = [1, 1, 1]} : vector<4x8x8xf32> to vector<1x8x8xf32>
    %55 = vector.shape_cast %54 : vector<1x8x8xf32> to vector<8x8xf32>
    %56 = vector.extract_strided_slice %50 {offsets = [1, 0, 0], sizes = [1, 8, 8], strides = [1, 1, 1]} : vector<4x8x8xf32> to vector<1x8x8xf32>
    %57 = vector.shape_cast %56 : vector<1x8x8xf32> to vector<8x8xf32>
    %58 = vector.extract_strided_slice %50 {offsets = [2, 0, 0], sizes = [1, 8, 8], strides = [1, 1, 1]} : vector<4x8x8xf32> to vector<1x8x8xf32>
    %59 = vector.shape_cast %58 : vector<1x8x8xf32> to vector<8x8xf32>
    %60 = vector.extract_strided_slice %50 {offsets = [3, 0, 0], sizes = [1, 8, 8], strides = [1, 1, 1]} : vector<4x8x8xf32> to vector<1x8x8xf32>
    %61 = vector.shape_cast %60 : vector<1x8x8xf32> to vector<8x8xf32>
    %62 = tpu.concatenate %55, %57, %59, %61 in 1 : vector<8x8xf32>, vector<8x8xf32>, vector<8x8xf32>, vector<8x8xf32> -> vector<8x32xf32>
    %63 = vector.shape_cast %62 : vector<8x32xf32> to vector<1x8x32xf32>
    %c0_11 = arith.constant 0 : index
    %c0_12 = arith.constant 0 : index
    %c0_13 = arith.constant 0 : index
    %c0_14 = arith.constant 0 : index
    %64 = vector.load %arg8[%c0_11, %c0_12, %c0_13, %c0_14] : memref<1x1x8x32xf32, #tpu.memory_space<vmem>>, vector<1x1x8x32xf32>
    %65 = vector.shape_cast %64 : vector<1x1x8x32xf32> to vector<1x8x32xf32>
    %66 = vector.shape_cast %63 : vector<1x8x32xf32> to vector<1x1x8x32xf32>
    tpu.vector_store %arg8[%c0_11, %c0_12, %c0_13, %c0_14], %66 {strides = array<i32>} : memref<1x1x8x32xf32, #tpu.memory_space<vmem>>, vector<1x1x8x32xf32>,
    %67 = vector.extract_strided_slice %53 {offsets = [0, 0, 0], sizes = [1, 8, 8], strides = [1, 1, 1]} : vector<4x8x8xf32> to vector<1x8x8xf32>
    %68 = vector.shape_cast %67 : vector<1x8x8xf32> to vector<8x8xf32>
    %69 = vector.extract_strided_slice %53 {offsets = [1, 0, 0], sizes = [1, 8, 8], strides = [1, 1, 1]} : vector<4x8x8xf32> to vector<1x8x8xf32>
    %70 = vector.shape_cast %69 : vector<1x8x8xf32> to vector<8x8xf32>
    %71 = vector.extract_strided_slice %53 {offsets = [2, 0, 0], sizes = [1, 8, 8], strides = [1, 1, 1]} : vector<4x8x8xf32> to vector<1x8x8xf32>
    %72 = vector.shape_cast %71 : vector<1x8x8xf32> to vector<8x8xf32>
    %73 = vector.extract_strided_slice %53 {offsets = [3, 0, 0], sizes = [1, 8, 8], strides = [1, 1, 1]} : vector<4x8x8xf32> to vector<1x8x8xf32>
    %74 = vector.shape_cast %73 : vector<1x8x8xf32> to vector<8x8xf32>
    %75 = tpu.concatenate %68, %70, %72, %74 in 1 : vector<8x8xf32>, vector<8x8xf32>, vector<8x8xf32>, vector<8x8xf32> -> vector<8x32xf32>
    %76 = arith.truncf %75 : vector<8x32xf32> to vector<8x32xbf16>
    %c0_15 = arith.constant 0 : index
    %c0_16 = arith.constant 0 : index
    %c0_17 = arith.constant 0 : index
    %77 = vector.load %arg4[%c0_15, %c0_16, %c0_17] : memref<1x32x32xbf16, #tpu.memory_space<vmem>>, vector<1x32x32xbf16>
    %78 = vector.shape_cast %77 : vector<1x32x32xbf16> to vector<32x32xbf16>
    %cst_18 = arith.constant dense<0.000000e+00> : vector<8x32xf32>
    %79 = tpu.matmul %76, %78, %cst_18 {dimension_numbers = #tpu.dot_dimension_numbers<[1], [0], [0], [1], [0, 0, 1, 1], [], []>} : vector<8x32xbf16>, vector<32x32xbf16>, vector<8x32xf32> -> vector<8x32xf32>
    %80 = arith.addf %79, %4 : vector<8x32xf32>
    %cst_19 = arith.constant dense<0.000000e+00> : vector<8xf32>
    %81 = vector.multi_reduction <add>, %80, %cst_19 [1] : vector<8x32xf32> to vector<8xf32>
    %82 = vector.shape_cast %81 : vector<8xf32> to vector<8x1xf32>
    %cst_20 = arith.constant 3.200000e+01 : f32
    %83 = vector.broadcast %cst_20 : f32 to vector<8x1xf32>
    %84 = arith.divf %82, %83 : vector<8x1xf32>
    %85 = vector.broadcast %84 : vector<8x1xf32> to vector<8x32xf32>
    %86 = arith.subf %80, %85 : vector<8x32xf32>
    %87 = arith.mulf %86, %86 : vector<8x32xf32>
    %cst_21 = arith.constant dense<0.000000e+00> : vector<8xf32>
    %88 = vector.multi_reduction <add>, %87, %cst_21 [1] : vector<8x32xf32> to vector<8xf32>
    %89 = vector.shape_cast %88 : vector<8xf32> to vector<8x1xf32>
    %cst_22 = arith.constant 3.200000e+01 : f32
    %90 = vector.broadcast %cst_22 : f32 to vector<8x1xf32>
    %91 = arith.divf %89, %90 : vector<8x1xf32>
    %92 = vector.broadcast %84 : vector<8x1xf32> to vector<8x32xf32>
    %93 = arith.subf %80, %92 : vector<8x32xf32>
    %cst_23 = arith.constant 9.99999974E-6 : f32
    %94 = vector.broadcast %cst_23 : f32 to vector<8x1xf32>
    %95 = arith.addf %91, %94 : vector<8x1xf32>
    %96 = math.rsqrt %95 : vector<8x1xf32>
    %97 = vector.broadcast %96 : vector<8x1xf32> to vector<8x32xf32>
    %98 = arith.mulf %93, %97 : vector<8x32xf32>
    %99 = arith.truncf %98 : vector<8x32xf32> to vector<8x32xbf16>
    %c0_24 = arith.constant 0 : index
    %c0_25 = arith.constant 0 : index
    %c0_26 = arith.constant 0 : index
    %100 = vector.load %arg5[%c0_24, %c0_25, %c0_26] : memref<1x32x64xbf16, #tpu.memory_space<vmem>>, vector<1x32x64xbf16>
    %101 = vector.shape_cast %100 : vector<1x32x64xbf16> to vector<32x64xbf16>
    %cst_27 = arith.constant dense<0.000000e+00> : vector<8x64xf32>
    %102 = tpu.matmul %99, %101, %cst_27 {dimension_numbers = #tpu.dot_dimension_numbers<[1], [0], [0], [1], [0, 0, 1, 1], [], []>} : vector<8x32xbf16>, vector<32x64xbf16>, vector<8x64xf32> -> vector<8x64xf32>
    %cst_28 = arith.constant 0.000000e+00 : f32
    %103 = vector.broadcast %cst_28 : f32 to vector<8x64xf32>
    %104 = arith.maximumf %102, %103 : vector<8x64xf32>
    %105 = arith.truncf %104 : vector<8x64xf32> to vector<8x64xbf16>
    %c0_29 = arith.constant 0 : index
    %c0_30 = arith.constant 0 : index
    %c0_31 = arith.constant 0 : index
    %106 = vector.load %arg6[%c0_29, %c0_30, %c0_31] : memref<1x64x32xbf16, #tpu.memory_space<vmem>>, vector<1x64x32xbf16>
    %107 = vector.shape_cast %106 : vector<1x64x32xbf16> to vector<64x32xbf16>
    %cst_32 = arith.constant dense<0.000000e+00> : vector<8x32xf32>
    %108 = tpu.matmul %105, %107, %cst_32 {dimension_numbers = #tpu.dot_dimension_numbers<[1], [0], [0], [1], [0, 0, 1, 1], [], []>} : vector<8x64xbf16>, vector<64x32xbf16>, vector<8x32xf32> -> vector<8x32xf32>
    %109 = arith.addf %108, %98 : vector<8x32xf32>
    %cst_33 = arith.constant dense<0.000000e+00> : vector<8xf32>
    %110 = vector.multi_reduction <add>, %109, %cst_33 [1] : vector<8x32xf32> to vector<8xf32>
    %111 = vector.shape_cast %110 : vector<8xf32> to vector<8x1xf32>
    %cst_34 = arith.constant 3.200000e+01 : f32
    %112 = vector.broadcast %cst_34 : f32 to vector<8x1xf32>
    %113 = arith.divf %111, %112 : vector<8x1xf32>
    %114 = vector.broadcast %113 : vector<8x1xf32> to vector<8x32xf32>
    %115 = arith.subf %109, %114 : vector<8x32xf32>
    %116 = arith.mulf %115, %115 : vector<8x32xf32>
    %cst_35 = arith.constant dense<0.000000e+00> : vector<8xf32>
    %117 = vector.multi_reduction <add>, %116, %cst_35 [1] : vector<8x32xf32> to vector<8xf32>
    %118 = vector.shape_cast %117 : vector<8xf32> to vector<8x1xf32>
    %cst_36 = arith.constant 3.200000e+01 : f32
    %119 = vector.broadcast %cst_36 : f32 to vector<8x1xf32>
    %120 = arith.divf %118, %119 : vector<8x1xf32>
    %121 = vector.broadcast %113 : vector<8x1xf32> to vector<8x32xf32>
    %122 = arith.subf %109, %121 : vector<8x32xf32>
    %cst_37 = arith.constant 9.99999974E-6 : f32
    %123 = vector.broadcast %cst_37 : f32 to vector<8x1xf32>
    %124 = arith.addf %120, %123 : vector<8x1xf32>
    %125 = math.rsqrt %124 : vector<8x1xf32>
    %126 = vector.broadcast %125 : vector<8x1xf32> to vector<8x32xf32>
    %127 = arith.mulf %122, %126 : vector<8x32xf32>
    %c0_38 = arith.constant 0 : index
    %c0_39 = arith.constant 0 : index
    %c0_40 = arith.constant 0 : index
    %128 = vector.load %arg7[%c0_38, %c0_39, %c0_40] : memref<1x8x32xf32, #tpu.memory_space<vmem>>, vector<1x8x32xf32>
    %129 = vector.shape_cast %128 : vector<1x8x32xf32> to vector<8x32xf32>
    %130 = vector.shape_cast %127 : vector<8x32xf32> to vector<1x8x32xf32>
    tpu.vector_store %arg7[%c0_38, %c0_39, %c0_40], %130 {strides = array<i32>} : memref<1x8x32xf32, #tpu.memory_space<vmem>>, vector<1x8x32xf32>,
    return
  }
  func.func @transform_0(%arg0: i32, %arg1: i32) -> (i32, i32, i32) {
    %c0_i32 = arith.constant 0 : i32
    %c0_i32_0 = arith.constant 0 : i32
    %c0_i32_1 = arith.constant 0 : i32
    return %arg0, %c0_i32, %c0_i32_0 : i32, i32, i32
  }
  func.func @transform_1(%arg0: i32, %arg1: i32) -> (i32, i32, i32) {
    %c0_i32 = arith.constant 0 : i32
    %c0_i32_0 = arith.constant 0 : i32
    %c0_i32_1 = arith.constant 0 : i32
    return %arg1, %c0_i32, %c0_i32_0 : i32, i32, i32
  }
  func.func @transform_2(%arg0: i32, %arg1: i32) -> (i32, i32, i32) {
    %c0_i32 = arith.constant 0 : i32
    %c0_i32_0 = arith.constant 0 : i32
    %c0_i32_1 = arith.constant 0 : i32
    return %arg1, %c0_i32, %c0_i32_0 : i32, i32, i32
  }
  func.func @transform_3(%arg0: i32, %arg1: i32) -> (i32, i32, i32) {
    %c0_i32 = arith.constant 0 : i32
    %c0_i32_0 = arith.constant 0 : i32
    %c0_i32_1 = arith.constant 0 : i32
    return %arg1, %c0_i32, %c0_i32_0 : i32, i32, i32
  }
  func.func @transform_4(%arg0: i32, %arg1: i32) -> (i32, i32, i32) {
    %c0_i32 = arith.constant 0 : i32
    %c0_i32_0 = arith.constant 0 : i32
    %c0_i32_1 = arith.constant 0 : i32
    return %arg1, %c0_i32, %c0_i32_0 : i32, i32, i32
  }
  func.func @transform_5(%arg0: i32, %arg1: i32) -> (i32, i32, i32) {
    %c0_i32 = arith.constant 0 : i32
    %c0_i32_0 = arith.constant 0 : i32
    %c0_i32_1 = arith.constant 0 : i32
    return %arg0, %c0_i32, %c0_i32_0 : i32, i32, i32
  }
  func.func @transform_6(%arg0: i32, %arg1: i32) -> (i32, i32, i32, i32) {
    %c0_i32 = arith.constant 0 : i32
    %c0_i32_0 = arith.constant 0 : i32
    %c0_i32_1 = arith.constant 0 : i32
    return %arg1, %arg0, %c0_i32, %c0_i32_0 : i32, i32, i32, i32
  }
}

</mosaic_0001>

<bundles_post_ra>
// kernel: tpu_custom_call.1
= control target key start
LH: loop header
LB: loop body
LE: loop exit
PB: predicated region body
PF: predicated region fallthrough
CT: control target
= control target key end

     0   :  { %s2355_s0 = inlined_call_operand.hbm [shape: f32[2,8,32], index: 0, kind: input, shape index: {}]   ;;  %s2356_s1 = inlined_call_operand.vmem [shape: bf16[2,32,96], index: 1, kind: input, shape index: {}]   ;;  %s2357_s2 = inlined_call_operand.vmem [shape: bf16[2,32,32], index: 2, kind: input, shape index: {}]   ;;  %s2358_s3 = inlined_call_operand.vmem [shape: bf16[2,32,64], index: 3, kind: input, shape index: {}]   ;;  %s2359_s4 = inlined_call_operand.vmem [shape: bf16[2,64,32], index: 4, kind: input, shape index: {}]   ;;  %s2360_s5 = inlined_call_operand.hbm [shape: f32[2,8,32], index: 5, kind: output, shape index: {0}]   ;;  %s2361_s6 = inlined_call_operand.hbm [shape: f32[2,2,8,32], index: 6, kind: output, shape index: {1}]  }
   0x1   :  { %2377 = sst [smem:[#allocation24_spill]] %s2355_s0 }
   0x2   :  { %2378 = sst [smem:[#allocation25_spill]] %s2360_s5 }
   0x3   :  { %12 = vsyncpa [#allocation3], 0 }
   0x4   :  { %14 = vsyncpa [#allocation3 + $0x1], 0 }
   0x5   :  { %15 = vsyncpa [#allocation4], 0 }
   0x6   :  { %17 = vsyncpa [#allocation4 + $0x1], 0 }
   0x7   :  { %18 = vsyncpa [#allocation7], 0 }
   0x8   :  { %20 = vsyncpa [#allocation7 + $0x1], 0  ;;  %s1901_s21 = smov 0   ;;  %s1903_s22 = smov 0  }
   0x9   :  { %s1905_s23 = smov 0   ;;  %s1907_s24 = smov 0  }
   0xa   :  { %s1909_s25 = smov 0   ;;  %s1911_s26 = smov 0  }
   0xb   :  { %s1913_s27 = smov 0   ;;  %s1915_s28 = smov 0  }
   0xc   :  { %s1917_s29 = smov 0   ;;  %s1919_s30 = smov 0  }
   0xd   :  { %s1921_s7 = smov 0  }
   0xe LB: > { %2379 = sst [smem:[#allocation11_spill]] %s1811_s21  ;;  %s1354_s8 = sadd.s32 4294967295, %s1851_s7   ;;  %s1851_s7 = sphi %s1921_s7, %s26_s7   ;;  %s1847_s30 = sphi %s1919_s30, %s2422_s30   ;;  %s1843_s29 = sphi %s1917_s29, %s2426_s29   ;;  %s1839_s28 = sphi %s1915_s28, %s2420_s28   ;;  %s1835_s27 = sphi %s1913_s27, %s2419_s27   ;;  %s1831_s26 = sphi %s1911_s26, %s2418_s26   ;;  %s1827_s25 = sphi %s1909_s25, %s2417_s25   ;;  %s1823_s24 = sphi %s1907_s24, %s2416_s24   ;;  %s1819_s23 = sphi %s1905_s23, %s2425_s23   ;;  %s1815_s22 = sphi %s1903_s22, %s2424_s22   ;;  %s1811_s21 = sphi %s1901_s21, %s2423_s21  }
   0xf   : > { %2380 = sst [smem:[#allocation12_spill]] %s1819_s23  ;;  %s1355_s9 = sadd.s32 4294967294, %s1851_s7  }
  0x10   : > { %2381 = sst [smem:[#allocation13_spill]] %s1823_s24  ;;  %s35_s10 = sadd.s32 1, %s1843_s29 }
  0x11   : > { %2382 = sst [smem:[#allocation14_spill]] %s1827_s25  ;;  %s38_s11 = sadd.s32 1, %s1847_s30 }
  0x12   : > { %2383 = sst [smem:[#allocation15_spill]] %s1831_s26  ;;  %p36_p0 = scmp.ge.s32.totalorder %s35_s10, 2 }
  0x13   : > { %2384 = sst [smem:[#allocation16_spill]] %s1843_s29  ;;  %s45_s12 = sadd.s32 1, %s1831_s26 }
  0x14   : > { %2385 = sst [smem:[#allocation17_spill]] %s1847_s30  ;;  %p52_p1 = scmp.ne.s32.totalorder %s1831_s26, %s1827_s25 }
  0x15   : > { %p53_p2 = scmp.eq.s32.totalorder %s1851_s7, 0  ;;  %s2428_s10 = smov (%p36_p0, %s35_s10), 0 }
  0x16   : > { %2386 = sst [smem:[#allocation18_spill]] %s2428_s10  ;;  %s2430_s11 = smov (!%p36_p0, %s38_s11), %s1847_s30 }
  0x17   : > { %p1967_p3 = por %p53_p2, %p52_p1  ;;  %p58_p4 = scmp.ne.s32.totalorder %s1827_s25, %s1823_s24 }
  0x18   : > { %p40_p5 = scmp.ge.s32.totalorder %s2430_s11, 2  ;;  %p59_p6 = scmp.eq.s32.totalorder %s1354_s8, 0 }
  0x19   : > { %p1973_p7 = scmp.eq.s32.totalorder %s1354_s8, 3  ;;  %p1977_p8 = scmp.eq.s32.totalorder %s1355_s9, 3 }
  0x1a   : > { %s2432_s11 = smov (%p40_p5, %s2430_s11), 0  ;;  %p1983_p9 = por %p59_p6, %p58_p4 }
  0x1b   : > { %2390 = sst [smem:[#allocation19_spill]] %s2432_s11  ;;  %p1989_p10 = por %p1973_p7, %p52_p1 }
  0x1c   : > { %s42_s18 = ssub.s32 %s1847_s30, %s2432_s11  ;;  %p1997_p11 = por %p1977_p8, %p58_p4 }
  0x1d   : > { %s2392_s17 = scalar_select %p1989_p10, 1, 0 }
  0x1e   : > { %s2393_s19 = scalar_select %p1997_p11, 1, 0 }
  0x1f   : > { %p43_p12 = scmp.eq.s32.totalorder %s42_s18, 0  ;;  %s198_s20 = ssub.s32 %s1843_s29, %s2428_s10 }
  0x20   : > { %2394 = sst [smem:[#allocation20_spill]] %s2393_s19  ;;  %s200_s8 = sor.u32 %s198_s20, %s42_s18 }
  0x21   : > { %s203_s9 = sadd.s32 1, %s1819_s23  ;;  %p201_p13 = scmp.eq.s32.totalorder %s200_s8, 0 }
  0x22   : > { %s2005_s24 = scalar_select %p43_p12, %s1831_s26, %s45_s12  }
  0x23   : > { %p213_p0 = scmp.ne.s32.totalorder %s1819_s23, %s1815_s22  ;;  %p219_p1 = scmp.ne.s32.totalorder %s1815_s22, %s1811_s21 }
  0x24   : > { %2395 = sst [smem:[#allocation21_spill]] %s2005_s24  ;;  %p1537_p5 = scmp.lt.s32.totalorder %s1851_s7, 4 }
  0x25   : > { %s2012_s5 = scalar_select %p201_p13, %s1819_s23, %s203_s9  }
  0x26   : > { %p2016_p2 = por %p213_p0, %p1973_p7  ;;  %p2022_p4 = por %p219_p1, %p1977_p8 }
  0x27   : > { %2396 = sst [smem:[#allocation22_spill]] %s2012_s5  ;;  %s240_s12 = sand.u32 1, %s1831_s26  }
  0x28   : > { %s2397_s11 = scalar_select %p2016_p2, 1, 0 }
  0x29   : > { %s2398_s10 = scalar_select %p2022_p4, 1, 0 }
  0x2a   : > { %s1358_s18 = sshll.u32 %s240_s12, 3  ;;  %s1359_s20 = sshll.u32 %s1847_s30, 7 }
  0x2b   : > { %2399 = sst [smem:[#allocation23_spill]] %s2398_s10  ;;  %s2400_s0 = sld [smem:[#allocation24_spill]] }
  0x2c   : > { %s244_s14 = scalar_lea.vmem [#allocation2], %s1358_s18  ;;  %p2038_p6 = pnand %p1537_p5, %p1967_p3 }
  0x2d   : > { %s251_s9 = sshll.u32 %s244_s14, 4  ;;  %s241_s29 = scalar_lea.sflag [#allocation3], %s240_s12  ;;  %s2034_s9 = int_to_ptr.vmem [resolvable:$true] %s251_s9 }
  0x2e   : > { %p1669_p13 = pneg %p2038_p6 }
  0x31   : > { %s2032_s24 = scalar_lea.hbm %s2400_s0, %s1359_s20  ;;  %s1672_s13 = scalar_lea.hbm %s2400_s0, 256 }
  0x32   : > { %s1667_s20 = scalar_lea.hbm %s2032_s24, 128  ;;  %p1673_p3 = scmp.lt.u32.totalorder %s2032_s24, %s2400_s0 }
  0x33   : > { %p1668_p12 = scmp.ne.s32.totalorder %s2032_s24, %s1667_s20  ;;  %p1674_p5 = scmp.lt.u32.totalorder %s1672_s13, %s1667_s20 }
  0x34   : > { %p1676_p8 = scmp.lt.u32.totalorder %s1667_s20, %s2032_s24 }
  0x35   : > { %p1670_p0 = pnand %p1669_p13, %p1668_p12  ;;  %p1675_p7 = por %p1674_p5, %p1673_p3 }
  0x37   : > { %p1671_p1 = pneg %p1670_p0  ;;  %p1677_p4 = por %p1676_p8, %p1675_p7 }
  0x39   : > { %p1678_p11 = pnand %p1677_p4, %p1671_p1 }
  0x3b   : > { %1681 = shalt.err (!%p1678_p11)
}
  0x3c   : > { %s1682_s12 = scalar_lea.vmem %s2034_s9, 128  ;;  %s1853_s18 = smov [#allocation2]  }
  0x3d   : > { %p1683_p12 = scmp.ne.s32.totalorder %s2034_s9, %s1682_s12  ;;  %s1687_s8 = sshll.u32 %s1853_s18, 4  ;;  %s1688_s8 = int_to_ptr.vmem [resolvable:$false] %s1687_s8 }
  0x3e   : > { %s1689_s30 = scalar_lea.vmem %s1688_s8, 256  ;;  %p1690_p2 = scmp.lt.s32.totalorder %s2034_s9, %s1688_s8 }
  0x3f   : > { %p1685_p0 = pnand %p1683_p12, %p1669_p13  ;;  %p1691_p3 = scmp.lt.s32.totalorder %s1689_s30, %s1682_s12 }
  0x41   : > { %p1686_p10 = pneg %p1685_p0  ;;  %p1692_p5 = por %p1691_p3, %p1690_p2 }
  0x43   : > { %p1693_p7 = pnand %p1692_p5, %p1686_p10 }
  0x45   : > { %1696 = shalt.err (!%p1693_p7)
}
  0x46   : > { %1529 = dma.hbm_to_vmem [thread:$0]  (!%p2038_p6), %s2032_s24, 128, %s2034_s9, %s241_s29  }
  0x47   : > { %p2402_p11 = scmp.lt.s32.totalorder %s1851_s7, 5  ;;  %p2403_p4 = scmp.ge.s32.totalorder %s1851_s7, 1 }
  0x49   : > { %p289_p8 = pnand %p2403_p4, %p2402_p11 }
  0x4a   : > { %s2074_s20 = sand.u32 (!%p289_p8), 1, %s1827_s25  }
  0x4b   : > { %292 = sbr.rel (%p289_p8) target bundleno = 2714 (0xa9a), region = 40  ;;  %s1361_s13 = sshll.u32 (!%p289_p8), %s2074_s20, 3 }
  0x4c   : > { %s295_s14 = scalar_lea.sflag (!%p289_p8), [#allocation3], %s2074_s20  ;;  %s298_s12 = scalar_lea.vmem (!%p289_p8), [#allocation2], %s1361_s13 }
  0x52   : > { %1798 = dma.done.wait (%p1983_p9), %s295_s14, 128  }
  0x53   : > { %1800 = vsyncadd (%p1983_p9), %s295_s14, 4294967168  ;;  %s2373_s24 = sand.u32 1, %s1815_s22   ;;  %p352_p10 = scmp.lt.s32.totalorder %s1835_s27, 1 }
  0x54   : > { %s2085_s9 = sshll.u32 %s2373_s24, 3  ;;  %p1372_p9 = scmp.ne.s32.totalorder %s1835_s27, 0 }
  0x55   : > { %s353_s15 = scalar_select %p352_p10, %s1835_s27, 1 }
  0x56   : > { %s351_s19 = scalar_lea.vmem [#allocation6], %s2085_s9  ;;  %376 = sbr.rel (%p1372_p9) target bundleno = 93 (0x5d), region = 48  ;;  %v377_v0 = vld [vmem:[%s298_s12] sm:$0xff] (!%p1372_p9)  ;;  %vm378_vm0 = vcmask (!%p1372_p9), 261120  }
  0x57   : > { %s1402_s29 = sshll.u32 %s353_s15, 4  ;;  %s1405_s18 = sshll.u32 %s353_s15, 5 }
  0x58   : > { %s356_s0 = scalar_lea.vmem %s2356_s1, %s1402_s29  ;;  %s2095_s14 = scalar_lea.vmem %s2357_s2, %s1402_s29 }
  0x59   : > { %s2100_s23 = scalar_lea.vmem %s2358_s3, %s1402_s29  ;;  %s2105_s21 = scalar_lea.vmem %s2359_s4, %s1405_s18 }
  0x5a   : > { %s2107_s15 = scalar_lea.vmem [#allocation5], %s1361_s13 }
  0x5b   : > { %379 = vst.msk [vmem:[%s2107_s15] sm:$0xff] (!%p1372_p9), %vm378_vm0, %v377_v0 }
  0x5d PF: > { %v1637_v1 = vld [vmem:[%s356_s0] sm:$0xff]   ;;  %v1854_v2 = vmov 0.0   ;;  %v1638_v3 = vld [vmem:[%s356_s0 + $0x8] sm:$0xff]   ;;  %vm1855_vm1 = vmmov 0   ;;  %vm398_vm2 = vcmask 261120   ;;  %s1856_s0 = smov 104  }
  0x5e   : > { %1436 = vmatprep.subr.bf16.mxu0 %v1854_v2  ;;  %1444 = vmatprep.subr.bf16.mxu1 %v1854_v2  ;;  %s1857_s5 = smov 120   ;;  %s1858_s25 = smov 112   ;;  %vm459_vm3 = vcmask 64512   ;;  %vm710_vm4 = vcmask 1043456   ;;  %vm911_vm5 = vcmask 130048   ;;  %vm913_vm6 = vcmask 195584  }
  0x5f   : > { %1437 = vmatpush3.bf16.msra.mxu0 %v1637_v1  ;;  %1440 = vmatprep.mubr.msk.bf16.mxu0 %vm1855_vm1, %v1854_v2  ;;  %s1859_s26 = smov 96   ;;  %s1860_s10 = smov 64   ;;  %vm1099_vm7 = vcmask 523264  }
  0x60   : > { %1438 = vmatprep.subr.bf16.mxu0 %v1854_v2  ;;  %1446 = vmatprep.mubr.msk.bf16.mxu1 %vm1855_vm1, %v1854_v2  ;;  %s1861_s13 = smov 8   ;;  %s1862_s12 = smov 16  }
  0x61   : > { %s1863_s24 = smov 24   ;;  %s1191_s18 = sshll.u32 %s351_s19, 4  ;;  %s2253_s18 = int_to_ptr.vmem [resolvable:$true] %s1191_s18 }
  0x62   : > { %v2117_v4 = vld [vmem:[%s2107_s15] sm:$0xff]  ;;  %s2404_s16 = sand.u32 1, %s1815_s22   ;;  %p2405_p6 = scmp.ne.s32.totalorder %s2397_s11, 0 }
  0x63   : > { %v381_v5 = vpack.c.bf16 %v2117_v4, %v2117_v4  ;;  %1439 = vmatpush3.bf16.msra.mxu0 %v1638_v3 }
  0x64   : > { %1450 = vmatprep.subr.bf16.mxu0 %v1854_v2 }
  0x66   : > { %1441 = vmatmul.mubr.msk.bf16.vlgmr.msra.gmra.mrb[0].mxu0 %vm398_vm2, %v381_v5 }
  0x67   : > { %1452 = vmatprep.mubr.msk.bf16.mxu0 %vm1855_vm1, %v1854_v2 }
 0x139   : > { %v436_v6 = vpop.f32.mrb[0].mxu0 }
 0x13a   : > { %449 = vrot.lane.b32.xlu1 %v436_v6, %s1856_s0  ;;  %443 = vrot.lane.b32.xlu0 %v436_v6, %s1857_s5  ;;  %v1442_v7 = vpop.f32.mrb[1].mxu0  ;;  %v2128_v10 = vpack.c.bf16 %v436_v6, %v436_v6  ;;  %s1697_s0 = scalar_lea.vmem %s2253_s18, 128  ;;  %s1864_s5 = smov [#allocation6]  }
 0x13b   : > { %v439_v8 = vpop.f32.mrb[2].mxu0  ;;  %p1698_p2 = scmp.ne.s32.totalorder %s2253_s18, %s1697_s0 }
 0x13c   : > { %v1443_v9 = vpop.f32.mrb[3].mxu0 }
 0x13d   : > { %p1699_p13 = pnand %p1698_p2, %p2405_p6 }
 0x13e   : > { %446 = vrot.lane.b32.xlu0 %v436_v6, %s1858_s25  ;;  %457 = vrot.lane.b32.xlu1 %v2128_v10, %s1859_s26  ;;  %s1701_s25 = sshll.u32 %s1864_s5, 4  ;;  %s1702_s25 = int_to_ptr.vmem [resolvable:$false] %s1701_s25 }
 0x13f   : > { %p1700_p1 = pneg %p1699_p13  ;;  %p1704_p12 = scmp.lt.s32.totalorder %s2253_s18, %s1702_s25 }
 0x1ac   : > { %v450_v11 = vpop.permute.xlu1 %449  ;;  %v444_v12 = vpop.permute.xlu0 %443 }
 0x1ad   : > { %v453_v13 = vpack.c.bf16 %v444_v12, %v444_v12  ;;  %v2131_v16 = vpack.c.bf16 %v450_v11, %v450_v11 }
 0x1af   : > { %507 = vrot.lane.b32.xlu0 %v453_v13, %s1859_s26 }
 0x1b0   : > { %v447_v14 = vpop.permute.xlu0 %446  ;;  %v458_v15 = vpop.permute.xlu1 %457 }
 0x1b1   : > { %v2133_v17 = vpack.c.bf16 %v447_v14, %v447_v14  ;;  %v464_v18 = vsel %vm459_vm3, %v458_v15, 0 }
 0x1b2   : > { %1445 = vmatpush3.bf16.xpose.msra.mxu1 %v464_v18 }
 0x1b3   : > { %605 = vrot.lane.b32.xlu0 %v2131_v16, %s1859_s26  ;;  %556 = vrot.lane.b32.xlu1 %v2133_v17, %s1859_s26  ;;  %s1703_s26 = scalar_lea.vmem %s1702_s25, 256 }
 0x1b4   : > { %1456 = vmatprep.subr.bf16.mxu1 %v1854_v2  ;;  %p1705_p0 = scmp.lt.s32.totalorder %s1703_s26, %s1697_s0 }
 0x1b6   : > { %p1706_p3 = por %p1705_p0, %p1704_p12 }
 0x1b8   : > { %p1707_p5 = pnand %p1706_p3, %p1700_p1 }
 0x1b9   : > { %1447 = vmatmul.mubr.msk.bf16.vlgmr.msra.gmra.mrb[0].mxu1 %vm459_vm3, %v2128_v10 }
 0x1ba   : > { %1458 = vmatprep.mubr.msk.bf16.mxu1 %vm1855_vm1, %v1854_v2 }
 0x221   : > { %v508_v19 = vpop.permute.xlu0 %507 }
 0x222   : > { %v513_v20 = vsel %vm459_vm3, %v508_v19, 0 }
 0x223   : > { %1451 = vmatpush3.bf16.xpose.msra.mxu0 %v513_v20 }
 0x224   : > { %1462 = vmatprep.subr.bf16.mxu0 %v1854_v2 }
 0x225   : > { %v557_v21 = vpop.permute.xlu1 %556  ;;  %v606_v23 = vpop.permute.xlu0 %605 }
 0x226   : > { %v562_v22 = vsel %vm459_vm3, %v557_v21, 0  ;;  %v611_v24 = vsel %vm459_vm3, %v606_v23, 0 }
 0x227   : > { %1457 = vmatpush3.bf16.xpose.msra.mxu1 %v562_v22 }
 0x228   : > { %1468 = vmatprep.subr.bf16.mxu1 %v1854_v2 }
 0x22a   : > { %1453 = vmatmul.mubr.msk.bf16.vlgmr.msra.gmra.mrb[4].mxu0 %vm459_vm3, %v453_v13 }
 0x22b   : > { %1463 = vmatpush3.bf16.xpose.msra.mxu0 %v611_v24  ;;  %1464 = vmatprep.mubr.msk.bf16.mxu0 %vm1855_vm1, %v1854_v2 }
 0x22c   : > { %1474 = vmatprep.subr.bf16.mxu0 %v1854_v2 }
 0x22e   : > { %1459 = vmatmul.mubr.msk.bf16.vlgmr.msra.gmra.mrb[4].mxu1 %vm459_vm3, %v2133_v17 }
 0x22f   : > { %1470 = vmatprep.mubr.msk.bf16.mxu1 %vm1855_vm1, %v1854_v2 }
 0x232   : > { %1465 = vmatmul.mubr.msk.bf16.vlgmr.msra.gmra.mrb[8].mxu0 %vm459_vm3, %v2131_v16 }
 0x233   : > { %1476 = vmatprep.mubr.msk.bf16.mxu0 %vm1855_vm1, %v1854_v2 }
 0x28c   : > { %v500_v25 = vpop.f32.mrb[0].mxu1 }
 0x28d   : > { %v653_v26 = vmul.f32 0.35355338, %v500_v25  ;;  %v1448_v27 = vpop.f32.mrb[1].mxu1 }
 0x28e   : > { %v503_v28 = vpop.f32.mrb[2].mxu1 }
 0x28f   : > { %v1449_v29 = vpop.f32.mrb[3].mxu1  ;;  %v657_v30 = vsel %vm459_vm3, %v653_v26, -inf }
 0x290   : > { %658 = vmax.xlane.f32.xlu1 %v657_v30 }
 0x2fd   : > { %v549_v31 = vpop.f32.mrb[4].mxu0 }
 0x2fe   : > { %v654_v32 = vmul.f32 0.35355338, %v549_v31  ;;  %v1454_v33 = vpop.f32.mrb[5].mxu0 }
 0x2ff   : > { %v552_v34 = vpop.f32.mrb[6].mxu0 }
 0x300   : > { %v1455_v35 = vpop.f32.mrb[7].mxu0  ;;  %v660_v36 = vsel %vm459_vm3, %v654_v32, -inf }
 0x301   : > { %v598_v37 = vpop.f32.mrb[4].mxu1  ;;  %661 = vmax.xlane.f32.xlu0 %v660_v36  ;;  %v1639_v35 = vld [vmem:[%s2095_s14] sm:$0xff]   ;;  %v1640_v36 = vld [vmem:[%s2095_s14 + $0x8] sm:$0xff]   ;;  %s1163_s14 = scalar_lea.sflag [#allocation7], %s2404_s16 }
 0x302   : > { %v655_v38 = vmul.f32 0.35355338, %v598_v37  ;;  %v1460_v39 = vpop.f32.mrb[5].mxu1 }
 0x303   : > { %v601_v40 = vpop.f32.mrb[6].mxu1 }
 0x304   : > { %v1461_v41 = vpop.f32.mrb[7].mxu1  ;;  %v663_v42 = vsel %vm459_vm3, %v655_v38, -inf }
 0x305   : > { %664 = vmax.xlane.f32.xlu0 %v663_v42  ;;  %v647_v43 = vpop.f32.mrb[8].mxu0 }
 0x306   : > { %v656_v44 = vmul.f32 0.35355338, %v647_v43  ;;  %v1466_v45 = vpop.f32.mrb[9].mxu0 }
 0x307   : > { %v650_v46 = vpop.f32.mrb[10].mxu0 }
 0x308   : > { %v1467_v47 = vpop.f32.mrb[11].mxu0  ;;  %v666_v48 = vsel %vm459_vm3, %v656_v44, -inf }
 0x309   : > { %667 = vmax.xlane.f32.xlu1 %v666_v48 }
 0x31a   : > { %754 = vrot.lane.b32.xlu1 %v453_v13, %s1860_s10 }
 0x31b   : > { %705 = vrot.lane.b32.xlu0 %v2128_v10, %s1860_s10 }
 0x31d   : > { %v659_v49 = vpop.xlane.xlu1 %658 }
 0x31e   : > { %v669_v50 = vsub.f32 %v653_v26, %v659_v49 }
 0x320   : > { %v673_v51 = vmul.f32 1.442695, %v669_v50 }
 0x322   : > { %1647 = vpow2.f32 %v673_v51 }
 0x32c   : > { %v1648_v52 = vpop.eup %1647 }
 0x32d   : > { %v681_v53 = vsel %vm459_vm3, %v1648_v52, 0.0 }
 0x33a   : > { %682 = vadd.xlane.f32.xlu0 %v681_v53 }
 0x38e   : > { %v662_v54 = vpop.xlane.xlu0 %661 }
 0x38f   : > { %v670_v55 = vsub.f32 %v654_v32, %v662_v54 }
 0x391   : > { %v675_v56 = vmul.f32 1.442695, %v670_v55 }
 0x392   : > { %v665_v57 = vpop.xlane.xlu0 %664 }
 0x393   : > { %1649 = vpow2.f32 %v675_v56  ;;  %v671_v58 = vsub.f32 %v655_v38, %v665_v57 }
 0x395   : > { %v677_v59 = vmul.f32 1.442695, %v671_v58 }
 0x396   : > { %v706_v60 = vpop.permute.xlu0 %705  ;;  %v668_v61 = vpop.xlane.xlu1 %667 }
 0x397   : > { %1651 = vpow2.f32 %v677_v59  ;;  %v712_v62 = vsel %vm710_vm4, %v706_v60, 0  ;;  %v672_v63 = vsub.f32 %v656_v44, %v668_v61 }
 0x398   : > { %1469 = vmatpush3.bf16.msra.mxu1 %v712_v62 }
 0x399   : > { %v679_v0 = vmul.f32 1.442695, %v672_v63  ;;  %1480 = vmatprep.subr.bf16.mxu1 %v1854_v2 }
 0x39a   : > { %v755_v1 = vpop.permute.xlu1 %754 }
 0x39b   : > { %1653 = vpow2.f32 %v679_v0  ;;  %v760_v3 = vsel %vm710_vm4, %v755_v1, 0 }
 0x39c   : > { %1475 = vmatpush3.bf16.msra.mxu0 %v760_v3 }
 0x39d   : > { %v1650_v5 = vpop.eup %1649  ;;  %1486 = vmatprep.subr.bf16.mxu0 %v1854_v2 }
 0x39e   : > { %v684_v6 = vsel %vm459_vm3, %v1650_v5, 0.0 }
 0x39f   : > { %685 = vadd.xlane.f32.xlu1 %v684_v6  ;;  %v1643_v6 = vld [vmem:[%s2105_s21] sm:$0xff]  }
 0x3a1   : > { %v1652_v7 = vpop.eup %1651 }
 0x3a2   : > { %v687_v8 = vsel %vm459_vm3, %v1652_v7, 0.0 }
 0x3a3   : > { %688 = vadd.xlane.f32.xlu0 %v687_v8  ;;  %v1645_v8 = vld [vmem:[%s2105_s21 + $0x10] sm:$0xff]  }
 0x3a5   : > { %v1654_v9 = vpop.eup %1653 }
 0x3a6   : > { %v690_v10 = vsel %vm459_vm3, %v1654_v9, 0.0 }
 0x3a7   : > { %691 = vadd.xlane.f32.xlu1 %v690_v10 }
 0x3b8   : > { %802 = vrot.lane.b32.xlu1 %v2133_v17, %s1860_s10 }
 0x3b9   : > { %850 = vrot.lane.b32.xlu0 %v2131_v16, %s1860_s10 }
 0x3c7   : > { %v683_v11 = vpop.xlane.xlu0 %682 }
 0x3c8   : > { %1655 = vrcp.f32 %v683_v11 }
 0x3d2   : > { %v1656_v12 = vpop.eup %1655 }
 0x3d3   : > { %v2179_v13 = vmul.f32 %v1656_v12, %v1648_v52 }
 0x3d5   : > { %v701_v14 = vpack.c.bf16 %v2179_v13, %v2179_v13 }
 0x3d7   : > { %1471 = vmatmul.mubr.msk.bf16.vlgmr.msra.gmra.mrb[8].mxu1 %vm459_vm3, %v701_v14 }
 0x3d8   : > { %1482 = vmatprep.mubr.msk.bf16.mxu1 %vm1855_vm1, %v1854_v2 }
 0x42c   : > { %v686_v15 = vpop.xlane.xlu1 %685 }
 0x42d   : > { %1657 = vrcp.f32 %v686_v15 }
 0x430   : > { %v689_v18 = vpop.xlane.xlu0 %688 }
 0x431   : > { %1659 = vrcp.f32 %v689_v18  ;;  %v1646_v18 = vld [vmem:[%s2105_s21 + $0x18] sm:$0xff]  }
 0x434   : > { %v692_v17 = vpop.xlane.xlu1 %691  ;;  %v851_v21 = vpop.permute.xlu0 %850 }
 0x435   : > { %1661 = vrcp.f32 %v692_v17  ;;  %v856_v26 = vsel %vm710_vm4, %v851_v21, 0 }
 0x437   : > { %v1658_v16 = vpop.eup %1657 }
 0x438   : > { %v2186_v19 = vmul.f32 %v1658_v16, %v1650_v5  ;;  %v803_v20 = vpop.permute.xlu1 %802  ;;  %v1642_v5 = vld [vmem:[%s2100_s23 + $0x8] sm:$0xff]  }
 0x439   : > { %v808_v22 = vsel %vm710_vm4, %v803_v20, 0 }
 0x43a   : > { %1481 = vmatpush3.bf16.msra.mxu1 %v808_v22  ;;  %v702_v23 = vpack.c.bf16 %v2186_v19, %v2186_v19 }
 0x43b   : > { %v1660_v24 = vpop.eup %1659  ;;  %1492 = vmatprep.subr.bf16.mxu1 %v1854_v2 }
 0x43c   : > { %v2192_v25 = vmul.f32 %v1660_v24, %v1652_v7  ;;  %1477 = vmatmul.mubr.msk.bf16.vlgmr.msra.gmra.mrb[12].mxu0 %vm459_vm3, %v702_v23  ;;  %v1644_v7 = vld [vmem:[%s2105_s21 + $0x8] sm:$0xff]   ;;  %s1398_s21 = sshll.u32 %s1835_s27, 1 }
 0x43d   : > { %1487 = vmatpush3.bf16.msra.mxu0 %v856_v26  ;;  %1488 = vmatprep.mubr.msk.bf16.mxu0 %vm1855_vm1, %v1854_v2 }
 0x43e   : > { %v703_v27 = vpack.c.bf16 %v2192_v25, %v2192_v25  ;;  %1500 = vmatprep.subr.bf16.mxu0 %v1854_v2 }
 0x43f   : > { %v1662_v28 = vpop.eup %1661 }
 0x440   : > { %v700_v29 = vmul.f32 %v1662_v28, %v1654_v9  ;;  %1483 = vmatmul.mubr.msk.bf16.vlgmr.msra.gmra.mrb[12].mxu1 %vm459_vm3, %v703_v27 }
 0x441   : > { %1496 = vmatprep.mubr.msk.bf16.mxu1 %vm1855_vm1, %v1854_v2  ;;  %1493 = vmatpush3.bf16.msra.mxu1 %v1639_v35 }
 0x442   : > { %v704_v30 = vpack.c.bf16 %v700_v29, %v700_v29  ;;  %1494 = vmatprep.subr.bf16.mxu1 %v1854_v2 }
 0x444   : > { %1489 = vmatmul.mubr.msk.bf16.vlgmr.msra.gmra.mrb[16].mxu0 %vm459_vm3, %v704_v30 }
 0x445   : > { %1504 = vmatprep.mubr.msk.bf16.mxu0 %vm1855_vm1, %v1854_v2  ;;  %1495 = vmatpush3.bf16.msra.mxu1 %v1640_v36 }
 0x446   : > { %1508 = vmatprep.subr.bf16.mxu1 %v1854_v2 }
 0x4aa   : > { %v748_v31 = vpop.f32.mrb[8].mxu1 }
 0x4ab   : > { %v1472_v32 = vpop.f32.mrb[9].mxu1 }
 0x4ac   : > { %v751_v33 = vpop.f32.mrb[10].mxu1 }
 0x4ad   : > { %v1473_v34 = vpop.f32.mrb[11].mxu1 }
 0x50f   : > { %v796_v37 = vpop.f32.mrb[12].mxu0 }
 0x510   : > { %917 = vrot.lane.b32.xlu1 %v796_v37, %s1861_s13  ;;  %v1478_v38 = vpop.f32.mrb[13].mxu0 }
 0x511   : > { %v799_v39 = vpop.f32.mrb[14].mxu0 }
 0x512   : > { %v1479_v40 = vpop.f32.mrb[15].mxu0 }
 0x513   : > { %v844_v41 = vpop.f32.mrb[12].mxu1 }
 0x514   : > { %921 = vrot.lane.b32.xlu0 %v844_v41, %s1862_s12  ;;  %v1484_v42 = vpop.f32.mrb[13].mxu1 }
 0x515   : > { %v847_v43 = vpop.f32.mrb[14].mxu1 }
 0x516   : > { %v1485_v44 = vpop.f32.mrb[15].mxu1 }
 0x517   : > { %v892_v45 = vpop.f32.mrb[16].mxu0 }
 0x518   : > { %925 = vrot.lane.b32.xlu1 %v892_v45, %s1863_s24  ;;  %v1490_v46 = vpop.f32.mrb[17].mxu0 }
 0x519   : > { %v895_v47 = vpop.f32.mrb[18].mxu0 }
 0x51a   : > { %v1491_v48 = vpop.f32.mrb[19].mxu0 }
 0x582   : > { %v918_v49 = vpop.permute.xlu1 %917 }
 0x583   : > { %v928_v51 = vsel %vm459_vm3, %v748_v31, %v918_v49 }
 0x586   : > { %v922_v50 = vpop.permute.xlu0 %921 }
 0x587   : > { %v929_v52 = vsel %vm911_vm5, %v928_v51, %v922_v50 }
 0x58a   : > { %v926_v53 = vpop.permute.xlu1 %925 }
 0x58b   : > { %v930_v54 = vsel %vm913_vm6, %v929_v52, %v926_v53 }
 0x58c   : > { %v931_v55 = vpack.c.bf16 %v930_v54, %v930_v54 }
 0x58e   : > { %1497 = vmatmul.mubr.msk.bf16.vlgmr.msra.gmra.mrb[16].mxu1 %vm398_vm2, %v931_v55 }
 0x58f   : > { %1516 = vmatprep.mubr.msk.bf16.mxu1 %vm1855_vm1, %v1854_v2  ;;  %1509 = vmatpush3.bf16.msra.mxu1 %v1643_v6 }
 0x590   : > { %1510 = vmatprep.subr.bf16.mxu1 %v1854_v2 }
 0x593   : > { %1511 = vmatpush3.bf16.msra.mxu1 %v1644_v7 }
 0x594   : > { %1512 = vmatprep.subr.bf16.mxu1 %v1854_v2 }
 0x597   : > { %1513 = vmatpush3.bf16.msra.mxu1 %v1645_v8 }
 0x598   : > { %1514 = vmatprep.subr.bf16.mxu1 %v1854_v2 }
 0x59b   : > { %1515 = vmatpush3.bf16.msra.mxu1 %v1646_v18 }
 0x661   : > { %v985_v56 = vpop.f32.mrb[16].mxu1 }
 0x662   : > { %v986_v57 = vadd.f32 %v985_v56, %v2117_v4  ;;  %v1498_v58 = vpop.f32.mrb[17].mxu1  ;;  %v1641_v4 = vld [vmem:[%s2100_s23] sm:$0xff]   ;;  %s1187_s23 = sadd.s32 %s1839_s28, %s1398_s21 }
 0x663   : > { %v988_v59 = vpop.f32.mrb[18].mxu1  ;;  %1501 = vmatpush3.bf16.msra.mxu0 %v1641_v4  ;;  %s1399_s29 = sshll.u32 %s1187_s23, 7 }
 0x664   : > { %v1499_v60 = vpop.f32.mrb[19].mxu1  ;;  %v991_v61 = vsel %vm398_vm2, %v986_v57, 0.0  ;;  %1502 = vmatprep.subr.bf16.mxu0 %v1854_v2  ;;  %s2251_s30 = scalar_lea.hbm %s2361_s6, %s1399_s29 }
 0x665   : > { %992 = vadd.xlane.f32.xlu0 %v991_v61 }
 0x667   : > { %1503 = vmatpush3.bf16.msra.mxu0 %v1642_v5 }
 0x6f2   : > { %v993_v62 = vpop.xlane.xlu0 %992 }
 0x6f3   : > { %v995_v63 = vmul.f32 0.03125, %v993_v62 }
 0x6f5   : > { %v996_v0 = vsub.f32 %v986_v57, %v995_v63 }
 0x6f7   : > { %v997_v1 = vmul.f32 %v996_v0, %v996_v0 }
 0x6f9   : > { %v998_v3 = vsel %vm398_vm2, %v997_v1, 0.0 }
 0x6fa   : > { %999 = vadd.xlane.f32.xlu1 %v998_v3 }
 0x70b   : > { %899 = vrot.lane.b32.xlu1 %v2186_v19, %s1861_s13 }
 0x70f   : > { %907 = vrot.lane.b32.xlu1 %v700_v29, %s1863_s24 }
 0x787   : > { %v1000_v9 = vpop.xlane.xlu1 %999 }
 0x788   : > { %v1001_v10 = vmul.f32 0.03125, %v1000_v9 }
 0x78a   : > { %v1002_v11 = vadd.f32 1e-05, %v1001_v10 }
 0x78b   : > { %v900_v34 = vpop.permute.xlu1 %899 }
 0x78c   : > { %1663 = vrsqrt.f32 %v1002_v11  ;;  %v910_v38 = vsel %vm459_vm3, %v2179_v13, %v900_v34 }
 0x78f   : > { %v908_v40 = vpop.permute.xlu1 %907 }
 0x796   : > { %v1664_v12 = vpop.eup %1663 }
 0x797   : > { %v1004_v14 = vmul.f32 %v1664_v12, %v996_v0 }
 0x799   : > { %v1005_v15 = vpack.c.bf16 %v1004_v14, %v1004_v14 }
 0x79b   : > { %1505 = vmatmul.mubr.msk.bf16.vlgmr.msra.gmra.mrb[20].mxu0 %vm398_vm2, %v1005_v15 }
 0x86e   : > { %v1059_v17 = vpop.f32.mrb[20].mxu0 }
 0x86f   : > { %v1065_v16 = vmax.f32 %v1059_v17, 0.0  ;;  %v1506_v19 = vpop.f32.mrb[21].mxu0 }
 0x870   : > { %v1062_v20 = vpop.f32.mrb[22].mxu0 }
 0x871   : > { %v1066_v21 = vpack.c.bf16 %v1065_v16, %v1065_v16  ;;  %v1507_v22 = vpop.f32.mrb[23].mxu0 }
 0x873   : > { %1517 = vmatmul.mubr.msk.bf16.vlgmr.msra.gmra.mrb[20].mxu1 %vm1099_vm7, %v1066_v21 }
 0x946   : > { %v1137_v2 = vpop.f32.mrb[20].mxu1 }
 0x947   : > { %v1138_v23 = vadd.f32 %v1137_v2, %v1004_v14  ;;  %v1518_v24 = vpop.f32.mrb[21].mxu1 }
 0x948   : > { %v1140_v26 = vpop.f32.mrb[22].mxu1 }
 0x949   : > { %v1519_v27 = vpop.f32.mrb[23].mxu1  ;;  %v1143_v28 = vsel %vm398_vm2, %v1138_v23, 0.0 }
 0x94a   : > { %1144 = vadd.xlane.f32.xlu0 %v1143_v28 }
 0x9d7   : > { %v1145_v29 = vpop.xlane.xlu0 %1144 }
 0x9d8   : > { %v1146_v30 = vmul.f32 0.03125, %v1145_v29 }
 0x9da   : > { %v1147_v31 = vsub.f32 %v1138_v23, %v1146_v30 }
 0x9dc   : > { %v1148_v32 = vmul.f32 %v1147_v31, %v1147_v31 }
 0x9de   : > { %v1149_v33 = vsel %vm398_vm2, %v1148_v32, 0.0 }
 0x9df   : > { %1150 = vadd.xlane.f32.xlu0 %v1149_v33 }
 0x9f5   : > { %903 = vrot.lane.b32.xlu0 %v2192_v25, %s1862_s12 }
 0xa6c   : > { %v1151_v35 = vpop.xlane.xlu0 %1150 }
 0xa6d   : > { %v1152_v36 = vmul.f32 0.03125, %v1151_v35 }
 0xa6f   : > { %v1153_v37 = vadd.f32 1e-05, %v1152_v36 }
 0xa70   : > { %v904_v39 = vpop.permute.xlu0 %903 }
 0xa71   : > { %1665 = vrsqrt.f32 %v1153_v37  ;;  %v912_v25 = vsel %vm911_vm5, %v910_v38, %v904_v39 }
 0xa72   : > { %v914_v41 = vsel %vm913_vm6, %v912_v25, %v908_v40 }
 0xa73   : > { %915 = vst.msk [vmem:[%s351_s19] sm:$0xff] %vm398_vm2, %v914_v41 }
 0xa74   : > { %1710 = shalt.err (!%p1707_p5)
}
 0xa75   : > { %s1711_s19 = scalar_lea.hbm %s2251_s30, 128  ;;  %s1715_s13 = scalar_lea.hbm %s2361_s6, 512 }
 0xa76   : > { %p1712_p7 = scmp.ne.s32.totalorder %s2251_s30, %s1711_s19  ;;  %p1716_p8 = scmp.lt.u32.totalorder %s2251_s30, %s2361_s6 }
 0xa77   : > { %p1717_p10 = scmp.lt.u32.totalorder %s1715_s13, %s1711_s19  ;;  %p1719_p2 = scmp.lt.u32.totalorder %s1711_s19, %s2251_s30 }
 0xa78   : > { %p1713_p11 = pnand %p1712_p7, %p2405_p6 }
 0xa79   : > { %p1718_p9 = por %p1717_p10, %p1716_p8 }
 0xa7a   : > { %p1714_p4 = pneg %p1713_p11 }
 0xa7b   : > { %p1720_p13 = por %p1719_p2, %p1718_p9 }
 0xa7d   : > { %p1721_p1 = pnand %p1720_p13, %p1714_p4 }
 0xa7f   : > { %1724 = shalt.err (!%p1721_p1)
}
 0xa80   : > { %1523 = dma.vmem_to_hbm [thread:$0]  (%p2405_p6), %s2253_s18, 128, %s2251_s30, %s1163_s14   ;;  %v1666_v13 = vpop.eup %1665 }
 0xa81   : > { %s1397_s21 = sshll.u32 %s1839_s28, 7  ;;  %s1176_s23 = sshll.u32 %s2107_s15, 4  ;;  %v1155_v42 = vmul.f32 %v1666_v13, %v1147_v31  ;;  %s2289_s23 = int_to_ptr.vmem [resolvable:$true] %s1176_s23 }
 0xa82   : > { %s2406_s8 = sld [smem:[#allocation25_spill]]  ;;  %s1158_s11 = scalar_lea.sflag [#allocation4], %s2074_s20 }
 0xa83   : > { %1156 = vst.msk [vmem:[%s2107_s15] sm:$0xff] %vm398_vm2, %v1155_v42  ;;  %s1725_s0 = scalar_lea.vmem %s2289_s23, 128  ;;  %p2407_p6 = scmp.ne.s32.totalorder %s2392_s17, 0 }
 0xa84   : > { %p1726_p12 = scmp.ne.s32.totalorder %s2289_s23, %s1725_s0  ;;  %s1865_s28 = smov [#allocation5]  }
 0xa85   : > { %s1729_s18 = sshll.u32 %s1865_s28, 4  ;;  %s1730_s18 = int_to_ptr.vmem [resolvable:$false] %s1729_s18 }
 0xa86   : > { %p1727_p0 = pnand %p1726_p12, %p2407_p6  ;;  %s1731_s30 = scalar_lea.vmem %s1730_s18, 256 }
 0xa87   : > { %p1732_p5 = scmp.lt.s32.totalorder %s2289_s23, %s1730_s18  ;;  %p1733_p7 = scmp.lt.s32.totalorder %s1731_s30, %s1725_s0 }
 0xa88   : > { %s2287_s16 = scalar_lea.hbm %s2406_s8, %s1397_s21  ;;  %p1728_p3 = pneg %p1727_p0 }
 0xa89   : > { %p1734_p11 = por %p1733_p7, %p1732_p5 }
 0xa8b   : > { %p1735_p4 = pnand %p1734_p11, %p1728_p3 }
 0xa8d   : > { %1738 = shalt.err (!%p1735_p4)
}
 0xa8e   : > { %s1739_s20 = scalar_lea.hbm %s2287_s16, 128  ;;  %s1743_s5 = scalar_lea.hbm %s2406_s8, 256 }
 0xa8f   : > { %p1740_p8 = scmp.ne.s32.totalorder %s2287_s16, %s1739_s20  ;;  %p1744_p2 = scmp.lt.u32.totalorder %s2287_s16, %s2406_s8 }
 0xa90   : > { %p1745_p13 = scmp.lt.u32.totalorder %s1743_s5, %s1739_s20  ;;  %p1747_p12 = scmp.lt.u32.totalorder %s1739_s20, %s2287_s16 }
 0xa91   : > { %p1741_p10 = pnand %p1740_p8, %p2407_p6 }
 0xa92   : > { %p1746_p1 = por %p1745_p13, %p1744_p2 }
 0xa93   : > { %p1742_p9 = pneg %p1741_p10 }
 0xa94   : > { %p1748_p0 = por %p1747_p12, %p1746_p1 }
 0xa96   : > { %p1749_p3 = pnand %p1748_p0, %p1742_p9 }
 0xa98   : > { %1752 = shalt.err (!%p1749_p3)
}
 0xa99   : > { %1522 = dma.vmem_to_hbm [thread:$0]  (%p2407_p6), %s2289_s23, 128, %s2287_s16, %s1158_s11  }
 0xa9a PF: > { %s2408_s19 = sld [smem:[#allocation13_spill]]  ;;  %s2409_s9 = sld [smem:[#allocation20_spill]] }
 0xa9b   : > { %p1538_p5 = scmp.ge.s32.totalorder %s1851_s7, 2 }
 0xaa0   : > { %s1203_s10 = sand.u32 1, %s2408_s19   ;;  %p2410_p7 = scmp.ne.s32.totalorder %s2409_s9, 0 }
 0xaa1   : > { %s1204_s13 = scalar_lea.sflag [#allocation4], %s1203_s10 }
 0xaa2   : > { %p1531_p11 = pnand %p1538_p5, %p2410_p7 }
 0xaa4   : > { %1802 = dma.done.wait (!%p1531_p11), %s1204_s13, 128  }
 0xaa5   : > { %1804 = vsyncadd (!%p1531_p11), %s1204_s13, 4294967168  ;;  %s2411_s12 = sld [smem:[#allocation11_spill]]  ;;  %s2412_s24 = sld [smem:[#allocation23_spill]] }
 0xaab   : > { %s1212_s21 = sand.u32 1, %s2411_s12   ;;  %p2413_p4 = scmp.ne.s32.totalorder %s2412_s24, 0 }
 0xaac   : > { %s1213_s17 = scalar_lea.sflag [#allocation7], %s1212_s21 }
 0xaad   : > { %p1534_p8 = pnand %p1538_p5, %p2413_p4 }
 0xaaf   : > { %1806 = dma.done.wait (!%p1534_p8), %s1213_s17, 128  }
 0xab0   : > { %1808 = vsyncadd (!%p1534_p8), %s1213_s17, 4294967168  ;;  %s26_s7 = sadd.s32 1, %s1851_s7   ;;  %s2414_s23 = sld [smem:[#allocation12_spill]] }
 0xab1   : > { %p23_p6 = scmp.ge.s32.totalorder %s26_s7, 6   ;;  %s2415_s29 = sld [smem:[#allocation22_spill]] }
 0xab2   : > { %s2416_s24 = sld [smem:[#allocation14_spill]]  ;;  %s2417_s25 = sld [smem:[#allocation15_spill]] }
 0xab3   : > { %s2418_s26 = sld [smem:[#allocation21_spill]]  ;;  %s2419_s27 = sld [smem:[#allocation16_spill]] }
 0xab4   : > { %s2420_s28 = sld [smem:[#allocation17_spill]]  ;;  %s2421_s16 = sld [smem:[#allocation18_spill]] }
 0xab5   : > { %s2422_s30 = sld [smem:[#allocation19_spill]]  ;;  %s2423_s21 = smov %s1815_s22 }
 0xab6   : > { %s2424_s22 = smov %s2414_s23  ;;  %25 = sbr.rel (!%p23_p6) target bundleno = 14 (0xe), region = 118 }
 0xab7   : > { %s2425_s23 = smov %s2415_s29 }
 0xaba   : > { %s2426_s29 = smov %s2421_s16 }
 0xabd   :  { %1218 = vsyncpa [#allocation3], 1 }
 0xabe   :  { %1220 = vsyncpa [#allocation3 + $0x1], 1 }
 0xabf   :  { %1221 = vsyncpa [#allocation4], 1 }
 0xac0   :  { %1223 = vsyncpa [#allocation4 + $0x1], 1 }
 0xac1   :  { %1224 = vsyncpa [#allocation7], 1 }
 0xac2   :  { %1226 = vsyncpa [#allocation7 + $0x1], 1 }

</bundles_post_ra>
